<compile_context>
chip_gen: v7x
topology: tpu7x:2x2x1
jax: 0.10.0
libtpu: 0.0.40
codegen_flags: <defaults>
</compile_context>

<pallas_src>
import functools
import math

import jax
import jax.numpy as jnp
from jax.experimental import pallas as pl
from jax.experimental.pallas import tpu as pltpu


def _cq_attention_kernel(c_ref, q_ref, w_ref, bias_ref, out_ref, *,
                         mxu_dtype, approx_recip):
    f32 = jnp.float32
    c = c_ref[...].astype(f32)            # (G, Lc, D)
    q = q_ref[...].astype(f32)            # (G, Lq, D)
    w = w_ref[...].astype(f32)            # (3, D): rows = [wc, wq, wm]
    wc, wq, wm = w[0], w[1], w[2]
    # Scalar bias from SMEM.  It is shift-invariant through both softmaxes
    # (mathematically a no-op) but kept for parity with the torch graph.
    bias = bias_ref[0, 0]

    G, Lc, D = c.shape
    Lq = q.shape[1]

    # ---- trilinear similarity, fully folded into one matmul per orientation:
    #   S[b,i,j] = (C*wm)[b,i].Q[b,j] + C[b,i].wc + 1.(Q*wq)[b,j] + bias
    lhs = jnp.concatenate([c * wm, c, jnp.ones((G, Lc, D), f32)], axis=-1)
    rhs = jnp.concatenate([q, jnp.broadcast_to(wc, (G, Lq, D)), q * wq], axis=-1)
    lhs_m = lhs.astype(mxu_dtype)
    rhs_m = rhs.astype(mxu_dtype)

    s = jnp.einsum("bld,bqd->blq", lhs_m, rhs_m,
                   preferred_element_type=f32) + bias            # (G, Lc, Lq)
    st = jnp.einsum("bqd,bld->bql", rhs_m, lhs_m,
                    preferred_element_type=f32) + bias           # (G, Lq, Lc)

    # ---- Sq: softmax over the query axis (torch dim=2); lane-axis reductions.
    sq = jnp.exp(s - jnp.max(s, axis=-1, keepdims=True))
    den_q = jnp.sum(sq, axis=-1, keepdims=True)

    # ---- Sc^T: softmax over the context axis (torch dim=1), computed as the
    # row softmax of S^T; the result is exactly the (G, Lq, Lc) operand the
    # reassociated B consumes.
    sct = jnp.exp(st - jnp.max(st, axis=-1, keepdims=True))
    den_c = jnp.sum(sct, axis=-1, keepdims=True)

    if approx_recip:                       # bf16/perf path only
        sq = sq * pl.reciprocal(den_q, approx=True)
        sct = sct * pl.reciprocal(den_c, approx=True)
    else:                                  # exact f32 path
        sq = sq / den_q
        sct = sct / den_c

    # ---- A = Sq @ Q ;  B = Sq @ (Sc^T @ C)  (reassociated, no (Lc,Lc) temp).
    a = jnp.einsum("blq,bqd->bld", sq.astype(mxu_dtype), q.astype(mxu_dtype),
                   preferred_element_type=f32)                   # (G, Lc, D)
    tmp = jnp.einsum("bql,bld->bqd", sct.astype(mxu_dtype), c.astype(mxu_dtype),
                     preferred_element_type=f32)                 # (G, Lq, D)
    b_mat = jnp.einsum("blq,bqd->bld", sq.astype(mxu_dtype),
                       tmp.astype(mxu_dtype),
                       preferred_element_type=f32)               # (G, Lc, D)

    # ---- single lane-dense (4*D-wide) store instead of four masked D-wide ones.
    # TODO(synk): F.dropout(p=0.1, training=True) is stochastic; kernel emits
    # the deterministic (inference) result instead of replaying torch's RNG.
    out_ref[...] = jnp.concatenate([c, a, c * a, c * b_mat],
                                   axis=-1).astype(out_ref.dtype)


def _vmem_capacity_bytes():
    """Physical VMEM per TensorCore; conservative 64 MiB (v7x floor) fallback."""
    try:
        return int(pltpu.get_tpu_info().vmem_capacity_bytes)
    except Exception:
        return 64 * 1024 * 1024


def _per_batch_vmem_bytes(Lc, Lq, D, io_itemsize):
    """Rough per-batch-element footprint: double-buffered tiles + f32 temps."""
    io = 2 * (Lc * D + Lq * D + Lc * 4 * D) * io_itemsize
    temps = (2 * Lc * 3 * D          # lhs (+ cast)
             + 2 * Lq * 3 * D        # rhs (+ cast)
             + 4 * Lc * Lq           # s, sq
             + 4 * Lq * Lc           # st, sct
             + 7 * Lc * D            # a, b, c*a, c*b, output slab pieces
             + 2 * Lq * D) * 4       # tmp = Sc^T @ C
    return io + temps


def cq_attention(C, Q, weight, bias, *, mxu_dtype=None, batch_group=8):
    """C: (B, Lc, D), Q: (B, Lq, D), weight: (1, 3D), bias: (1,) -> (B, Lc, 4D)."""
    B, Lc, D = C.shape
    _, Lq, _ = Q.shape

    # MXU operand dtype: bf16 only pays off once the matmuls stop being
    # padding-dominated; at small shapes f32 avoids all pack/cast VALU work
    # (and v5e's VPU has no bf16 at all).
    if mxu_dtype is None:
        big = (D >= 128) and (Lc >= 256) and (Lq >= 64)
        mxu_dtype = jnp.bfloat16 if big else jnp.float32
    approx_recip = (mxu_dtype != jnp.float32)

    # Pack [wc | wq | wm] as rows of one (3, D) VMEM tile; bias goes to SMEM.
    w_packed = weight.reshape(3, D)
    bias2 = bias.reshape(1, 1).astype(jnp.float32)

    # ---- choose the batch group size g (VMEM-aware, >= 2 grid steps). -------
    vmem_cap = _vmem_capacity_bytes()
    per_b = max(1, _per_batch_vmem_bytes(Lc, Lq, D, C.dtype.itemsize))
    g_vmem = max(1, int(0.75 * vmem_cap) // per_b)
    g_tc = max(1, B // 2)     # keep >= 2 "parallel" steps so v7x's second TC
                              # gets work (sub-us cost on 1-TC v5e/v6e)
    g_cap = max(1, min(batch_group, g_vmem, g_tc, B))
    g = max(d for d in range(1, g_cap + 1) if B % d == 0)
    # NOTE: for very long contexts (Lc >~ 2-3K) the context axis should also be
    # tiled with a two-pass column softmax; not needed at these shapes.

    # Explicit scoped-VMEM limit: the output tile is 4x the input tile and is
    # double-buffered, so the 16/32 MiB scoped default is hit well before the
    # hardware limit once g or the sequence lengths grow.
    needed = per_b * g + 4 * (3 * D + 1024)
    vmem_limit = int(min(vmem_cap, max(2 * needed, 32 * 1024 * 1024)))

    kernel = functools.partial(_cq_attention_kernel,
                               mxu_dtype=mxu_dtype, approx_recip=approx_recip)
    return pl.pallas_call(
        kernel,
        out_shape=jax.ShapeDtypeStruct((B, Lc, 4 * D), C.dtype),
        grid_spec=pltpu.PrefetchScalarGridSpec(
            num_scalar_prefetch=0,
            grid=(B // g,),
            in_specs=[
                pl.BlockSpec((g, Lc, D), lambda b: (b, 0, 0)),
                pl.BlockSpec((g, Lq, D), lambda b: (b, 0, 0)),
                pl.BlockSpec((3, D), lambda b: (0, 0)),
                pl.BlockSpec(memory_space=pltpu.MemorySpace.SMEM),
            ],
            out_specs=pl.BlockSpec((g, Lc, 4 * D), lambda b: (b, 0, 0)),
        ),
        compiler_params=pltpu.CompilerParams(
            dimension_semantics=("parallel",),
            vmem_limit_bytes=vmem_limit),
    )(C, Q, w_packed, bias2)


def _reference(C, Q, weight, bias):
    """Pure-JAX replica of the torch forward (dropout omitted)."""
    B, Lc, D = C.shape
    Lq = Q.shape[1]
    Ct = C[:, :, None, :]                                     # (B, Lc, 1, D)
    Qt = Q[:, None, :, :]                                     # (B, 1, Lq, D)
    CQ = Ct * Qt                                              # (B, Lc, Lq, D)
    S_feat = jnp.concatenate(
        [jnp.broadcast_to(Ct, (B, Lc, Lq, D)),
         jnp.broadcast_to(Qt, (B, Lc, Lq, D)),
         CQ], axis=3)                                         # (B, Lc, Lq, 3D)
    S = jnp.einsum("blqk,k->blq", S_feat, weight[0]) + bias[0]
    Sq = jax.nn.softmax(S, axis=2)
    Sc = jax.nn.softmax(S, axis=1)
    A = jnp.einsum("blq,bqd->bld", Sq, Q)
    Bm = jnp.einsum("blq,bmq,bmd->bld", Sq, Sc, C)
    return jnp.concatenate([C, A, C * A, C * Bm], axis=2)


if __name__ == "__main__":
    B, Lc, Lq, D = 2, 16, 8, 32   # encoder_size = 32

    key = jax.random.PRNGKey(0)
    kc, kq, kw, kb = jax.random.split(key, 4)
    C = jax.random.normal(kc, (B, Lc, D), dtype=jnp.float32)
    Q = jax.random.normal(kq, (B, Lq, D), dtype=jnp.float32)

    # Wo = nn.Linear(3*D, 1): weight uniform(+-sqrt(1/D)) per module init,
    # bias uniform(+-1/sqrt(3*D)) per default Linear init.
    w_bound = math.sqrt(1.0 / D)
    b_bound = 1.0 / math.sqrt(3 * D)
    weight = jax.random.uniform(kw, (1, 3 * D), jnp.float32, -w_bound, w_bound)
    bias = jax.random.uniform(kb, (1,), jnp.float32, -b_bound, b_bound)

    ref = _reference(C, Q, weight, bias)

    # Default path (auto -> f32 MXU operands at these small shapes): tight tol.
    out_f32 = jax.block_until_ready(cq_attention(C, Q, weight, bias))
    assert out_f32.shape == (B, Lc, 4 * D)
    assert jnp.allclose(out_f32, ref, atol=1e-4, rtol=1e-4), "f32 mismatch vs reference"

    # Forced bf16 MXU path (f32 accumulation, approx reciprocal): loose tol.
    out_bf16 = jax.block_until_ready(
        cq_attention(C, Q, weight, bias, mxu_dtype=jnp.bfloat16))
    assert out_bf16.shape == (B, Lc, 4 * D)
    assert jnp.allclose(out_bf16, ref, atol=5e-2, rtol=5e-2), "bf16 mismatch vs reference"

    print("KERNEL_OK")
</pallas_src>

<mosaic_0001>
module attributes {stable_mosaic.version = 11 : i64} {
  func.func @_cq_attention_kernel(%arg0: i32, %arg1: memref<1x16x32xf32, #tpu.memory_space<vmem>>, %arg2: memref<1x8x32xf32, #tpu.memory_space<vmem>>, %arg3: memref<3x32xf32, #tpu.memory_space<vmem>>, %arg4: memref<1x1xf32, #tpu.memory_space<smem>>, %arg5: memref<1x16x128xf32, #tpu.memory_space<vmem>>) attributes {dimension_semantics = [#tpu.dimension_semantics<parallel>], iteration_bounds = array<i64: 2>, scalar_prefetch = 0 : i64, scratch_operands = 0 : i64, tpu.core_type = #tpu.core_type<tc>, window_params = [{transform_indices = @transform_0, window_bounds = array<i64: 1, 16, 32>}, {transform_indices = @transform_1, window_bounds = array<i64: 1, 8, 32>}, {pipeline_mode = #tpu.pipeline_mode<synchronous>, transform_indices = @transform_2, window_bounds = array<i64: 3, 32>}, {transform_indices = @transform_3, window_bounds = array<i64: 1, 1>}, {transform_indices = @transform_4, window_bounds = array<i64: 1, 16, 128>}]} {
    %c0 = arith.constant 0 : index
    %c0_0 = arith.constant 0 : index
    %c0_1 = arith.constant 0 : index
    %0 = vector.load %arg1[%c0, %c0_0, %c0_1] : memref<1x16x32xf32, #tpu.memory_space<vmem>>, vector<1x16x32xf32>
    %c0_2 = arith.constant 0 : index
    %c0_3 = arith.constant 0 : index
    %c0_4 = arith.constant 0 : index
    %1 = vector.load %arg2[%c0_2, %c0_3, %c0_4] : memref<1x8x32xf32, #tpu.memory_space<vmem>>, vector<1x8x32xf32>
    %c0_5 = arith.constant 0 : index
    %c0_6 = arith.constant 0 : index
    %2 = vector.load %arg3[%c0_5, %c0_6] : memref<3x32xf32, #tpu.memory_space<vmem>>, vector<3x32xf32>
    %3 = vector.extract_strided_slice %2 {offsets = [0, 0], sizes = [1, 32], strides = [1, 1]} : vector<3x32xf32> to vector<1x32xf32>
    %4 = vector.shape_cast %3 : vector<1x32xf32> to vector<32xf32>
    %5 = vector.extract_strided_slice %2 {offsets = [1, 0], sizes = [1, 32], strides = [1, 1]} : vector<3x32xf32> to vector<1x32xf32>
    %6 = vector.shape_cast %5 : vector<1x32xf32> to vector<32xf32>
    %7 = vector.extract_strided_slice %2 {offsets = [2, 0], sizes = [1, 32], strides = [1, 1]} : vector<3x32xf32> to vector<1x32xf32>
    %8 = vector.shape_cast %7 : vector<1x32xf32> to vector<32xf32>
    %c0_7 = arith.constant 0 : index
    %c0_8 = arith.constant 0 : index
    %9 = memref.load %arg4[%c0_7, %c0_8] : memref<1x1xf32, #tpu.memory_space<smem>>
    %10 = vector.shape_cast %8 : vector<32xf32> to vector<1x1x32xf32>
    %11 = vector.broadcast %10 : vector<1x1x32xf32> to vector<1x16x32xf32>
    %12 = arith.mulf %0, %11 : vector<1x16x32xf32>
    %cst = arith.constant 1.000000e+00 : f32
    %13 = vector.broadcast %cst : f32 to vector<1x16x32xf32>
    %14 = tpu.concatenate %12, %0, %13 in 2 : vector<1x16x32xf32>, vector<1x16x32xf32>, vector<1x16x32xf32> -> vector<1x16x96xf32>
    %15 = vector.shape_cast %4 : vector<32xf32> to vector<1x1x32xf32>
    %16 = vector.broadcast %15 : vector<1x1x32xf32> to vector<1x8x32xf32>
    %17 = vector.shape_cast %6 : vector<32xf32> to vector<1x1x32xf32>
    %18 = vector.broadcast %17 : vector<1x1x32xf32> to vector<1x8x32xf32>
    %19 = arith.mulf %1, %18 : vector<1x8x32xf32>
    %20 = tpu.concatenate %1, %16, %19 in 2 : vector<1x8x32xf32>, vector<1x8x32xf32>, vector<1x8x32xf32> -> vector<1x8x96xf32>
    "tpu.trace_start"() <{level = 10 : i32, message = "bld,bqd->blq"}> : () -> ()
    %cst_9 = arith.constant dense<0.000000e+00> : vector<1x16x8xf32>
    %21 = tpu.matmul %14, %20, %cst_9 {dimension_numbers = #tpu.dot_dimension_numbers<[2], [2], [1], [1], [0, 0, 0, 1, 1, 1], [0], [0]>} : vector<1x16x96xf32>, vector<1x8x96xf32>, vector<1x16x8xf32> -> vector<1x16x8xf32>
    "tpu.trace_stop"() : () -> ()
    %22 = vector.broadcast %9 : f32 to vector<1x16x8xf32>
    %23 = arith.addf %21, %22 : vector<1x16x8xf32>
    "tpu.trace_start"() <{level = 10 : i32, message = "bqd,bld->bql"}> : () -> ()
    %cst_10 = arith.constant dense<0.000000e+00> : vector<1x8x16xf32>
    %24 = tpu.matmul %20, %14, %cst_10 {dimension_numbers = #tpu.dot_dimension_numbers<[2], [2], [1], [1], [0, 0, 0, 1, 1, 1], [0], [0]>} : vector<1x8x96xf32>, vector<1x16x96xf32>, vector<1x8x16xf32> -> vector<1x8x16xf32>
    "tpu.trace_stop"() : () -> ()
    %25 = vector.broadcast %9 : f32 to vector<1x8x16xf32>
    %26 = arith.addf %24, %25 : vector<1x8x16xf32>
    %cst_11 = arith.constant dense<0xFF800000> : vector<1x16xf32>
    %27 = vector.multi_reduction <maximumf>, %23, %cst_11 [2] : vector<1x16x8xf32> to vector<1x16xf32>
    %28 = vector.shape_cast %27 : vector<1x16xf32> to vector<1x16x1xf32>
    %29 = vector.broadcast %28 : vector<1x16x1xf32> to vector<1x16x8xf32>
    %30 = arith.subf %23, %29 : vector<1x16x8xf32>
    %31 = math.exp %30 : vector<1x16x8xf32>
    %cst_12 = arith.constant dense<0.000000e+00> : vector<1x16xf32>
    %32 = vector.multi_reduction <add>, %31, %cst_12 [2] : vector<1x16x8xf32> to vector<1x16xf32>
    %33 = vector.shape_cast %32 : vector<1x16xf32> to vector<1x16x1xf32>
    %cst_13 = arith.constant dense<0xFF800000> : vector<1x8xf32>
    %34 = vector.multi_reduction <maximumf>, %26, %cst_13 [2] : vector<1x8x16xf32> to vector<1x8xf32>
    %35 = vector.shape_cast %34 : vector<1x8xf32> to vector<1x8x1xf32>
    %36 = vector.broadcast %35 : vector<1x8x1xf32> to vector<1x8x16xf32>
    %37 = arith.subf %26, %36 : vector<1x8x16xf32>
    %38 = math.exp %37 : vector<1x8x16xf32>
    %cst_14 = arith.constant dense<0.000000e+00> : vector<1x8xf32>
    %39 = vector.multi_reduction <add>, %38, %cst_14 [2] : vector<1x8x16xf32> to vector<1x8xf32>
    %40 = vector.shape_cast %39 : vector<1x8xf32> to vector<1x8x1xf32>
    %41 = vector.broadcast %33 : vector<1x16x1xf32> to vector<1x16x8xf32>
    %42 = arith.divf %31, %41 : vector<1x16x8xf32>
    %43 = vector.broadcast %40 : vector<1x8x1xf32> to vector<1x8x16xf32>
    %44 = arith.divf %38, %43 : vector<1x8x16xf32>
    "tpu.trace_start"() <{level = 10 : i32, message = "blq,bqd->bld"}> : () -> ()
    %cst_15 = arith.constant dense<0.000000e+00> : vector<1x16x32xf32>
    %45 = tpu.matmul %42, %1, %cst_15 {dimension_numbers = #tpu.dot_dimension_numbers<[2], [1], [1], [2], [0, 0, 0, 1, 1, 2], [0], [0]>} : vector<1x16x8xf32>, vector<1x8x32xf32>, vector<1x16x32xf32> -> vector<1x16x32xf32>
    "tpu.trace_stop"() : () -> ()
    "tpu.trace_start"() <{level = 10 : i32, message = "bql,bld->bqd"}> : () -> ()
    %cst_16 = arith.constant dense<0.000000e+00> : vector<1x8x32xf32>
    %46 = tpu.matmul %44, %0, %cst_16 {dimension_numbers = #tpu.dot_dimension_numbers<[2], [1], [1], [2], [0, 0, 0, 1, 1, 2], [0], [0]>} : vector<1x8x16xf32>, vector<1x16x32xf32>, vector<1x8x32xf32> -> vector<1x8x32xf32>
    "tpu.trace_stop"() : () -> ()
    "tpu.trace_start"() <{level = 10 : i32, message = "blq,bqd->bld"}> : () -> ()
    %cst_17 = arith.constant dense<0.000000e+00> : vector<1x16x32xf32>
    %47 = tpu.matmul %42, %46, %cst_17 {dimension_numbers = #tpu.dot_dimension_numbers<[2], [1], [1], [2], [0, 0, 0, 1, 1, 2], [0], [0]>} : vector<1x16x8xf32>, vector<1x8x32xf32>, vector<1x16x32xf32> -> vector<1x16x32xf32>
    "tpu.trace_stop"() : () -> ()
    %48 = arith.mulf %0, %45 : vector<1x16x32xf32>
    %49 = arith.mulf %0, %47 : vector<1x16x32xf32>
    %50 = tpu.concatenate %0, %45, %48, %49 in 2 : vector<1x16x32xf32>, vector<1x16x32xf32>, vector<1x16x32xf32>, vector<1x16x32xf32> -> vector<1x16x128xf32>
    %c0_18 = arith.constant 0 : index
    %c0_19 = arith.constant 0 : index
    %c0_20 = arith.constant 0 : index
    %51 = vector.load %arg5[%c0_18, %c0_19, %c0_20] : memref<1x16x128xf32, #tpu.memory_space<vmem>>, vector<1x16x128xf32>
    tpu.vector_store %arg5[%c0_18, %c0_19, %c0_20], %50 {strides = array<i32>} : memref<1x16x128xf32, #tpu.memory_space<vmem>>, vector<1x16x128xf32>,
    return
  }
  func.func @transform_0(%arg0: i32) -> (i32, i32, i32) {
    %c0_i32 = arith.constant 0 : i32
    %c0_i32_0 = arith.constant 0 : i32
    %c0_i32_1 = arith.constant 0 : i32
    return %arg0, %c0_i32, %c0_i32_0 : i32, i32, i32
  }
  func.func @transform_1(%arg0: i32) -> (i32, i32, i32) {
    %c0_i32 = arith.constant 0 : i32
    %c0_i32_0 = arith.constant 0 : i32
    %c0_i32_1 = arith.constant 0 : i32
    return %arg0, %c0_i32, %c0_i32_0 : i32, i32, i32
  }
  func.func @transform_2(%arg0: i32) -> (i32, i32) {
    %c0_i32 = arith.constant 0 : i32
    %c0_i32_0 = arith.constant 0 : i32
    %c0_i32_1 = arith.constant 0 : i32
    return %c0_i32, %c0_i32_0 : i32, i32
  }
  func.func @transform_3(%arg0: i32) -> (i32, i32) {
    %c0_i32 = arith.constant 0 : i32
    %c0_i32_0 = arith.constant 0 : i32
    %c0_i32_1 = arith.constant 0 : i32
    return %c0_i32, %c0_i32_0 : i32, i32
  }
  func.func @transform_4(%arg0: i32) -> (i32, i32, i32) {
    %c0_i32 = arith.constant 0 : i32
    %c0_i32_0 = arith.constant 0 : i32
    %c0_i32_1 = arith.constant 0 : i32
    return %arg0, %c0_i32, %c0_i32_0 : i32, i32, i32
  }
}

</mosaic_0001>

<bundles_post_ra>
// kernel: tpu_custom_call.1
= control target key start
LH: loop header
LB: loop body
LE: loop exit
PB: predicated region body
PF: predicated region fallthrough
CT: control target
= control target key end

     0   :  { %s1460_s0 = inlined_call_operand.hbm [shape: f32[2,16,32], index: 0, kind: input, shape index: {}]   ;;  %s1461_s1 = inlined_call_operand.hbm [shape: f32[2,8,32], index: 1, kind: input, shape index: {}]   ;;  %s1462_s2 = inlined_call_operand.vmem [shape: f32[3,32], index: 2, kind: input, shape index: {}]   ;;  %s1463_s3 = inlined_call_operand.<no memory space> [shape: f32[1,1], index: 3, kind: input, shape index: {}]   ;;  %s1464_s4 = inlined_call_operand.hbm [shape: f32[2,16,128], index: 4, kind: output, shape index: {}]  }
   0x1   :  { %9 = sst [smem:[#allocation2]] %s1463_s3 }
   0x2   :  { %10 = vsyncpa [#allocation4], 0 }
   0x3   :  { %12 = vsyncpa [#allocation4 + $0x1], 0 }
   0x4   :  { %13 = vsyncpa [#allocation7], 0 }
   0x5   :  { %15 = vsyncpa [#allocation7 + $0x1], 0 }
   0x6   :  { %16 = vsyncpa [#allocation5], 0 }
   0x7   :  { %18 = vsyncpa [#allocation5 + $0x1], 0  ;;  %s1191_s17 = smov 0   ;;  %s1193_s18 = smov 0  }
   0x8   :  { %s1195_s19 = smov 0   ;;  %s1197_s20 = smov 0  }
   0x9 LB: > { %s1212_s3 = sadd.s32 4294967295, %s1148_s20   ;;  %s864_s21 = sadd.s32 4294967294, %s1148_s20   ;;  %s1148_s20 = sphi %s1197_s20, %s1481_s20   ;;  %s1144_s19 = sphi %s1195_s19, %s1480_s19   ;;  %s1140_s18 = sphi %s1193_s18, %s1479_s18   ;;  %s1136_s17 = sphi %s1191_s17, %s1478_s17  }
   0xa   : > { %s1216_s22 = sadd.s32 1, %s1148_s20   ;;  %s31_s23 = sadd.s32 1, %s1144_s19 }
   0xb   : > { %s28_s24 = ssub.s32 %s1148_s20, %s1216_s22  ;;  %p38_p0 = scmp.ne.s32.totalorder %s1144_s19, %s1140_s18 }
   0xc   : > { %p29_p1 = scmp.eq.s32.totalorder %s28_s24, 0  ;;  %p39_p2 = scmp.eq.s32.totalorder %s1148_s20, 0 }
   0xd   : > { %p44_p3 = scmp.ne.s32.totalorder %s1140_s18, %s1136_s17  ;;  %p45_p4 = scmp.eq.s32.totalorder %s1212_s3, 0 }
   0xe   : > { %s1228_s25 = scalar_select %p29_p1, %s1144_s19, %s31_s23  }
   0xf   : > { %p1230_p5 = por %p39_p2, %p38_p0  ;;  %p1234_p6 = por %p45_p4, %p44_p3 }
  0x10   : > { %p136_p7 = scmp.eq.s32.totalorder %s1212_s3, 1  ;;  %p142_p8 = scmp.eq.s32.totalorder %s864_s21, 1 }
  0x11   : > { %s1468_s27 = scalar_select %p1234_p6, 1, 0 }
  0x12   : > { %p962_p10 = scmp.lt.s32.totalorder %s1148_s20, 2  ;;  %p1241_p11 = por %p136_p7, %p38_p0 }
  0x13   : > { %p1245_p12 = por %p142_p8, %p44_p3  ;;  %s1250_s30 = sand.u32 1, %s1144_s19  }
  0x14   : > { %s1469_s28 = scalar_select %p1241_p11, 1, 0 }
  0x15   : > { %s1470_s29 = scalar_select %p1245_p12, 1, 0 }
  0x16   : > { %s892_s5 = sshll.u32 %s1148_s20, 8  ;;  %s867_s6 = sshll.u32 %s1250_s30, 4 }
  0x17   : > { %s1257_s9 = scalar_lea.hbm %s1460_s0, %s892_s5  ;;  %s172_s10 = scalar_lea.vmem [#allocation3], %s867_s6 }
  0x18   : > { %s179_s11 = sshll.u32 %s172_s10, 4  ;;  %p1261_p13 = pnand %p962_p10, %p1230_p5  ;;  %s1265_s11 = int_to_ptr.vmem [resolvable:$true] %s179_s11 }
  0x19   : > { %s169_s13 = scalar_lea.sflag [#allocation4], %s1250_s30  ;;  %s1018_s14 = scalar_lea.hbm %s1257_s9, 256 }
  0x1a   : > { %p1019_p0 = scmp.ne.s32.totalorder %s1257_s9, %s1018_s14  ;;  %p1020_p1 = pneg %p1261_p13 }
  0x1b   : > { %s1023_s21 = scalar_lea.hbm %s1460_s0, 512  ;;  %p1024_p4 = scmp.lt.u32.totalorder %s1257_s9, %s1460_s0 }
  0x1c   : > { %p1021_p2 = pnand %p1020_p1, %p1019_p0  ;;  %p1025_p5 = scmp.lt.u32.totalorder %s1023_s21, %s1018_s14 }
  0x1d   : > { %p1027_p8 = scmp.lt.u32.totalorder %s1018_s14, %s1257_s9 }
  0x1e   : > { %p1022_p3 = pneg %p1021_p2  ;;  %p1026_p7 = por %p1025_p5, %p1024_p4 }
  0x20   : > { %p1028_p10 = por %p1027_p8, %p1026_p7 }
  0x22   : > { %p1029_p9 = pnand %p1028_p10, %p1022_p3 }
  0x24   : > { %1032 = shalt.err (!%p1029_p9)
}
  0x25   : > { %s1033_s26 = scalar_lea.vmem %s1265_s11, 256  ;;  %s1150_s5 = smov [#allocation3]  }
  0x26   : > { %p1034_p0 = scmp.ne.s32.totalorder %s1265_s11, %s1033_s26  ;;  %s1038_s6 = sshll.u32 %s1150_s5, 4  ;;  %s1039_s6 = int_to_ptr.vmem [resolvable:$false] %s1038_s6 }
  0x27   : > { %s1040_s7 = scalar_lea.vmem %s1039_s6, 512  ;;  %p1041_p11 = scmp.lt.s32.totalorder %s1265_s11, %s1039_s6 }
  0x28   : > { %p1036_p2 = pnand %p1034_p0, %p1020_p1  ;;  %p1042_p4 = scmp.lt.s32.totalorder %s1040_s7, %s1033_s26 }
  0x2a   : > { %p1037_p12 = pneg %p1036_p2  ;;  %p1043_p5 = por %p1042_p4, %p1041_p11 }
  0x2c   : > { %p1044_p7 = pnand %p1043_p5, %p1037_p12 }
  0x2e   : > { %1047 = shalt.err (!%p1044_p7)
}
  0x2f   : > { %s1151_s8 = smov 128   ;;  %s1152_s10 = smov 8  }
  0x30   : > { %954 = dma.hbm_to_vmem [thread:$0]  (!%p1261_p13), %s1257_s9, 256, %s1265_s11, %s169_s13, %s1151_s8, %s1151_s8, %s1152_s10  }
  0x31   : > { %p872_p9 = scmp.ge.s32.totalorder %s1148_s20, 1  ;;  %p205_p3 = scmp.lt.s32.totalorder %s1148_s20, 3 }
  0x32   : > { %s870_s14 = sshll.u32 %s1250_s30, 3  ;;  %s871_s16 = sshll.u32 %s1148_s20, 7 }
  0x33   : > { %p1298_p11 = pnand %p872_p9, %p205_p3  ;;  %s193_s21 = scalar_lea.vmem [#allocation6], %s870_s14 }
  0x34   : > { %s200_s23 = sshll.u32 %s193_s21, 4  ;;  %s1306_s5 = scalar_lea.hbm %s1461_s1, %s871_s16  ;;  %s201_s23 = int_to_ptr.vmem [resolvable:$true] %s200_s23 }
  0x35   : > { %s1472_s15 = scalar_select %p1298_p11, 1, 0 }
  0x36   : > { %s190_s9 = scalar_lea.sflag [#allocation7], %s1250_s30  ;;  %s1048_s11 = scalar_lea.hbm %s1306_s5, 128 }
  0x37   : > { %p1049_p12 = scmp.ne.s32.totalorder %s1306_s5, %s1048_s11  ;;  %s1053_s7 = scalar_lea.hbm %s1461_s1, 256 }
  0x38   : > { %p1054_p0 = scmp.lt.u32.totalorder %s1306_s5, %s1461_s1  ;;  %p1055_p2 = scmp.lt.u32.totalorder %s1053_s7, %s1048_s11 }
  0x39   : > { %p1051_p8 = pnand %p1049_p12, %p1020_p1  ;;  %p1057_p5 = scmp.lt.u32.totalorder %s1048_s11, %s1306_s5 }
  0x3a   : > { %p1056_p4 = por %p1055_p2, %p1054_p0 }
  0x3b   : > { %p1052_p10 = pneg %p1051_p8 }
  0x3c   : > { %p1058_p7 = por %p1057_p5, %p1056_p4 }
  0x3e   : > { %p1059_p9 = pnand %p1058_p7, %p1052_p10 }
  0x40   : > { %1062 = shalt.err (!%p1059_p9)
}
  0x41   : > { %s1063_s30 = scalar_lea.vmem %s201_s23, 128  ;;  %s1153_s14 = smov [#allocation6]  }
  0x42   : > { %p1064_p3 = scmp.ne.s32.totalorder %s201_s23, %s1063_s30  ;;  %s1068_s16 = sshll.u32 %s1153_s14, 4  ;;  %s1069_s16 = int_to_ptr.vmem [resolvable:$false] %s1068_s16 }
  0x43   : > { %s1070_s21 = scalar_lea.vmem %s1069_s16, 256  ;;  %p1071_p6 = scmp.lt.s32.totalorder %s201_s23, %s1069_s16 }
  0x44   : > { %p1066_p12 = pnand %p1064_p3, %p1020_p1  ;;  %p1072_p11 = scmp.lt.s32.totalorder %s1070_s21, %s1063_s30 }
  0x46   : > { %p1067_p8 = pneg %p1066_p12  ;;  %p1073_p0 = por %p1072_p11, %p1071_p6 }
  0x48   : > { %p1074_p2 = pnand %p1073_p0, %p1067_p8 }
  0x4a   : > { %1077 = shalt.err (!%p1074_p2)
}
  0x4b   : > { %957 = dma.hbm_to_vmem [thread:$0]  (!%p1261_p13), %s1306_s5, 128, %s201_s23, %s190_s9  }
  0x4c   : > { %p1473_p10 = scmp.ne.s32.totalorder %s1472_s15, 0 }
  0x4d   : > { %s1331_s24 = sand.u32 (!%p1473_p10), 1, %s1140_s18   ;;  %p1474_p6 = scmp.ne.s32.totalorder (!%p1473_p10), %s1468_s27, 0 }
  0x4e   : > { %209 = sbr.rel (%p1473_p10) target bundleno = 1315 (0x523), region = 36  ;;  %s873_s26 = sshll.u32 (!%p1473_p10), %s1331_s24, 4 }
  0x4f   : > { %s212_s11 = scalar_lea.sflag (!%p1473_p10), [#allocation4], %s1331_s24  ;;  %s215_s13 = scalar_lea.vmem (!%p1473_p10), [#allocation3], %s873_s26 }
  0x55   : > { %1123 = dma.done.wait (%p1474_p6), %s212_s11, 256  }
  0x56   : > { %1125 = vsyncadd (%p1474_p6), %s212_s11, 4294967040  ;;  %s874_s12 = sshll.u32 %s1331_s24, 3  ;;  %s221_s15 = scalar_lea.sflag [#allocation7], %s1331_s24 }
  0x57   : > { %s224_s23 = scalar_lea.vmem [#allocation6], %s874_s12 }
  0x58   : > { %1127 = dma.done.wait (%p1474_p6), %s221_s15, 128  }
  0x59   : > { %1129 = vsyncadd (%p1474_p6), %s221_s15, 4294967168  ;;  %v259_v0 = vlaneseq  ;;  %v1154_v5 = vmov 0.0|0.0   ;;  %vm1155_vm0 = vmmov 0   ;;  %v1156_v6 = vmov 0.0   ;;  %v1349_v7 = vld [vmem:[%s215_s13 + $0x8] sm:$0xff]  ;;  %v256_v9 = vld [vmem:[%s224_s23] sm:$0xff] }
  0x5a   : > { %938 = vmatprep.subr.bf16.mxu1 %v1154_v5  ;;  %918 = vmatprep.mubr.msk.f32.mxu1 %vm1155_vm0, %v1156_v6  ;;  %v257_v8 = vld [vmem:[%s1462_s2] sm:$0x7]  ;;  %s1157_s27 = smov 32   ;;  %s1158_s6 = smov 64   ;;  %vm273_vm1 = vcmask 261120   ;;  %vm276_vm2 = vcmask 523264  }
  0x5b   : > { %v260_v1 = vshrl.u32 %v259_v0, 7  ;;  %269 = vrot.lane.b32.xlu1 %v1349_v7, %s1157_s27  ;;  %v1357_v14 = vld [vmem:[%s215_s13] sm:$0xff]  ;;  %vm299_vm3 = vcmask 785408   ;;  %s258_s7 = sld [smem:[#allocation2]]  ;;  %vm454_vm5 = vcmask 64512   ;;  %vm473_vm6 = vcmask 130048  }
  0x5c   : > { %vm940_vm4 = vmpackc.low %vm299_vm3, %vm299_vm3  ;;  %v943_v60 = vpack.c.bf16 %v1349_v7, %v1357_v14  ;;  %s1159_s8 = smov 96   ;;  %s253_s10 = scalar_lea.vmem [#allocation8], %s873_s26 }
  0x5d   : > { %v261_v2 = vsub.s32 2, %v260_v1  ;;  %v281_v3 = vsub.s32 0, %v260_v1  ;;  %v285_v4 = vsub.s32 1, %v260_v1  ;;  %s768_s30 = sshll.u32 %s253_s10, 4  ;;  %s893_s14 = sshll.u32 %s1212_s3, 8  ;;  %s1405_s30 = int_to_ptr.vmem [resolvable:$true] %s768_s30 }
  0x5e   : > { %s1413_s26 = scalar_lea.hbm %s1464_s4, %s893_s14  ;;  %s755_s3 = scalar_lea.sflag [#allocation5], %s1331_s24 }
  0x5f   : > { %v282_v10 = vrot.slane %v257_v8, %v281_v3  ;;  %v262_v11 = vrot.slane %v257_v8, %v261_v2  ;;  %v286_v12 = vrot.slane %v257_v8, %v285_v4  ;;  %s1078_s11 = scalar_lea.vmem %s1405_s30, 256  ;;  %p1475_p1 = scmp.ne.s32.totalorder %s1469_s28, 0 }
  0x60   : > { %p1079_p13 = scmp.ne.s32.totalorder %s1405_s30, %s1078_s11  ;;  %s1160_s13 = smov [#allocation8]  }
  0x61   : > { %289 = vrot.lane.b32.xlu0 %v282_v10, %s1157_s27  ;;  %v287_v13 = vmul.f32 %v286_v12, %v256_v9  ;;  %v264_v16 = vmul.f32 %v262_v11, %v1349_v7  ;;  %v263_v19 = vmul.f32 %v262_v11, %v1357_v14  ;;  %v298_v28 = vstv %s258_s7  ;;  %s1082_s12 = sshll.u32 %s1160_s13, 4  ;;  %s1083_s12 = int_to_ptr.vmem [resolvable:$false] %s1082_s12 }
  0x62   : > { %p1080_p11 = pnand %p1079_p13, %p1475_p1  ;;  %s1084_s15 = scalar_lea.vmem %s1083_s12, 512 }
  0x63   : > { %293 = vrot.lane.b32.xlu1 %v287_v13, %s1158_s6  ;;  %p1085_p5 = scmp.lt.s32.totalorder %s1405_s30, %s1083_s12  ;;  %p1086_p7 = scmp.lt.s32.totalorder %s1084_s15, %s1078_s11 }
  0x64   : > { %p1081_p4 = pneg %p1080_p11 }
  0x65   : > { %267 = vrot.lane.b32.xlu0 %v1357_v14, %s1157_s27  ;;  %p1087_p9 = por %p1086_p7, %p1085_p5 }
  0x67   : > { %p1088_p3 = pnand %p1087_p9, %p1081_p4 }
  0xcd   : > { %v270_v15 = vpop.permute.xlu1 %269 }
  0xce   : > { %v275_v21 = vsel %vm273_vm1, %v264_v16, %v270_v15 }
  0xcf   : > { %v278_v26 = vsel %vm276_vm2, %v275_v21, 1.0 }
  0xd3   : > { %v290_v17 = vpop.permute.xlu0 %289 }
  0xd4   : > { %v296_v18 = vsel %vm273_vm1, %v256_v9, %v290_v17 }
  0xd5   : > { %v294_v20 = vpop.permute.xlu1 %293 }
  0xd6   : > { %v297_v22 = vsel %vm276_vm2, %v296_v18, %v294_v20 }
  0xd7   : > { %909 = vmatprep.subr.msk.mxu0 %vm299_vm3, %v297_v22  ;;  %v268_v23 = vpop.permute.xlu0 %267 }
  0xd8   : > { %910 = vmatpush3.xpose.msk.msra.mxu0 %vm299_vm3, %v297_v22  ;;  %v274_v24 = vsel %vm273_vm1, %v263_v19, %v268_v23 }
  0xd9   : > { %v277_v25 = vsel %vm276_vm2, %v274_v24, 1.0  ;;  %921 = vmatprep.subr.mxu0 %v256_v9 }
  0xda   : > { %911 = vmatprep.mubr.msk.f32.mxu0 %vm299_vm3, %v277_v25  ;;  %v939_v27 = vpack.c.bf16 %v278_v26, %v277_v25 }
  0xdb   : > { %912 = vmatmul.mubr.msk.f32.vlgmr.msra.gmra.mrb[0].mxu0 %vm299_vm3, %v278_v26 }
  0xdc   : > { %941 = vmatpush3.bf16.xpose.msk.msra.mxu1 %vm940_vm4, %v939_v27  ;;  %922 = vmatpush3.msra.mxu0 %v256_v9 }
  0xdd   : > { %942 = vmatprep.subr.bf16.mxu0 %v1154_v5 }
  0xe3   : > { %919 = vmatmul.mubr.msk.f32.vlgmr.msra.gmra.mrb[0].mxu1 %vm299_vm3, %v297_v22 }
 0x1ae   : > { %v913_v29 = vpop.f32.mrb[0].mxu0 }
 0x1af   : > { %v381_v30 = vadd.f32 %v913_v29, %v298_v28  ;;  %v375_v31 = vpop.f32.mrb[1].mxu0 }
 0x1b0   : > { %v376_v32 = vadd.f32 %v375_v31, %v298_v28 }
 0x1b1   : > { %v458_v33 = vsel %vm454_vm5, %v381_v30, -inf }
 0x1b2   : > { %459 = vmax.xlane.f32.xlu1 %v458_v33  ;;  %v455_v34 = vsel %vm454_vm5, %v376_v32, -inf }
 0x1b3   : > { %456 = vmax.xlane.f32.xlu0 %v455_v34 }
 0x1b6   : > { %v450_v35 = vpop.f32.mrb[0].mxu1 }
 0x1b7   : > { %v451_v36 = vadd.f32 %v450_v35, %v298_v28  ;;  %v920_v37 = vpop.f32.mrb[1].mxu1 }
 0x1b9   : > { %v474_v38 = vsel %vm473_vm6, %v451_v36, -inf }
 0x1ba   : > { %475 = vmax.xlane.f32.xlu0 %v474_v38 }
 0x23f   : > { %v460_v39 = vpop.xlane.xlu1 %459 }
 0x240   : > { %v462_v40 = vsub.f32 %v381_v30, %v460_v39  ;;  %v457_v41 = vpop.xlane.xlu0 %456 }
 0x241   : > { %v461_v42 = vsub.f32 %v376_v32, %v457_v41 }
 0x242   : > { %v465_v43 = vmul.f32 1.442695, %v462_v40 }
 0x243   : > { %v463_v44 = vmul.f32 1.442695, %v461_v42 }
 0x244   : > { %1006 = vpow2.f32 %v465_v43 }
 0x245   : > { %1008 = vpow2.f32 %v463_v44 }
 0x247   : > { %v476_v45 = vpop.xlane.xlu0 %475 }
 0x248   : > { %v477_v46 = vsub.f32 %v451_v36, %v476_v45 }
 0x24a   : > { %v478_v47 = vmul.f32 1.442695, %v477_v46 }
 0x24c   : > { %1010 = vpow2.f32 %v478_v47 }
 0x24e   : > { %v1007_v48 = vpop.eup %1006 }
 0x24f   : > { %v1009_v49 = vpop.eup %1008  ;;  %v470_v50 = vsel %vm454_vm5, %v1007_v48, 0.0 }
 0x250   : > { %471 = vadd.xlane.f32.xlu1 %v470_v50  ;;  %v467_v51 = vsel %vm454_vm5, %v1009_v49, 0.0 }
 0x251   : > { %468 = vadd.xlane.f32.xlu0 %v467_v51 }
 0x256   : > { %v1011_v52 = vpop.eup %1010 }
 0x257   : > { %v480_v53 = vsel %vm473_vm6, %v1011_v52, 0.0 }
 0x258   : > { %481 = vadd.xlane.f32.xlu0 %v480_v53 }
 0x2dd   : > { %v472_v54 = vpop.xlane.xlu1 %471 }
 0x2de   : > { %1012 = vrcp.f32 %v472_v54  ;;  %v469_v55 = vpop.xlane.xlu0 %468 }
 0x2df   : > { %1014 = vrcp.f32 %v469_v55 }
 0x2e5   : > { %v482_v56 = vpop.xlane.xlu0 %481 }
 0x2e6   : > { %1016 = vrcp.f32 %v482_v56 }
 0x2e8   : > { %v1013_v57 = vpop.eup %1012 }
 0x2e9   : > { %v1015_v58 = vpop.eup %1014  ;;  %v486_v61 = vmul.f32 %v1013_v57, %v1007_v48 }
 0x2ea   : > { %v484_v59 = vmul.f32 %v1015_v58, %v1009_v49 }
 0x2ec   : > { %923 = vmatprep.mubr.msk.f32.mxu0 %vm454_vm5, %v484_v59  ;;  %935 = vmatprep.mubr.msk.f32.mxu1 %vm454_vm5, %v484_v59 }
 0x2ed   : > { %924 = vmatmul.mubr.msk.f32.vlgmr.msra.gmra.mrb[2].mxu0 %vm454_vm5, %v486_v61 }
 0x2ee   : > { %944 = vmatpush3.bf16.msra.mxu0 %v943_v60  ;;  %930 = vmatprep.mubr.msk.f32.mxu0 %vm1155_vm0, %v1156_v6 }
 0x2f0   : > { %v1017_v62 = vpop.eup %1016 }
 0x2f1   : > { %v488_v63 = vmul.f32 %v1017_v62, %v1011_v52 }
 0x2f3   : > { %931 = vmatmul.mubr.msk.f32.vlgmr.msra.gmra.mrb[4].mxu0 %vm473_vm6, %v488_v63 }
 0x3c0   : > { %v925_v0 = vpop.f32.mrb[2].mxu0 }
 0x3c1   : > { %726 = vrot.lane.b32.xlu0 %v925_v0, %s1157_s27  ;;  %v561_v1 = vpop.f32.mrb[3].mxu0  ;;  %v719_v2 = vmul.f32 %v925_v0, %v1349_v7 }
 0x3c2   : > { %724 = vrot.lane.b32.xlu1 %v561_v1, %s1157_s27  ;;  %v718_v5 = vmul.f32 %v561_v1, %v1357_v14 }
 0x3c6   : > { %734 = vrot.lane.b32.xlu1 %v719_v2, %s1158_s6  ;;  %v639_v3 = vpop.f32.mrb[4].mxu0 }
 0x3c7   : > { %v932_v4 = vpop.f32.mrb[5].mxu0  ;;  %933 = vmatprep.subr.mxu1 %v639_v3 }
 0x3c8   : > { %934 = vmatpush3.msra.mxu1 %v639_v3 }
 0x3c9   : > { %936 = vmatmul.mubr.msk.f32.vlgmr.msra.gmra.mrb[2].mxu1 %vm454_vm5, %v486_v61 }
 0x3ca   : > { %732 = vrot.lane.b32.xlu1 %v718_v5, %s1158_s6 }
 0x433   : > { %v727_v13 = vpop.permute.xlu0 %726 }
 0x434   : > { %v725_v11 = vpop.permute.xlu1 %724  ;;  %v747_v16 = vsel %vm273_vm1, %v1349_v7, %v727_v13 }
 0x435   : > { %v746_v17 = vsel %vm273_vm1, %v1357_v14, %v725_v11 }
 0x438   : > { %v735_v12 = vpop.permute.xlu1 %734 }
 0x439   : > { %v749_v18 = vsel %vm276_vm2, %v747_v16, %v735_v12 }
 0x43c   : > { %v733_v15 = vpop.permute.xlu1 %732 }
 0x43d   : > { %v748_v20 = vsel %vm276_vm2, %v746_v17, %v733_v15 }
 0x49c   : > { %v937_v6 = vpop.f32.mrb[2].mxu1 }
 0x49d   : > { %v721_v8 = vmul.f32 %v937_v6, %v1349_v7  ;;  %v709_v9 = vpop.f32.mrb[3].mxu1 }
 0x49e   : > { %v720_v10 = vmul.f32 %v709_v9, %v1357_v14 }
 0x49f   : > { %742 = vrot.lane.b32.xlu1 %v721_v8, %s1159_s8 }
 0x4a0   : > { %740 = vrot.lane.b32.xlu0 %v720_v10, %s1159_s8 }
 0x511   : > { %v743_v19 = vpop.permute.xlu1 %742 }
 0x512   : > { %v751_v7 = vsel %vm299_vm3, %v749_v18, %v743_v19  ;;  %v741_v21 = vpop.permute.xlu0 %740 }
 0x513   : > { %753 = vst [vmem:[%s253_s10 + $0x8] sm:$0xff] %v751_v7  ;;  %v750_v22 = vsel %vm299_vm3, %v748_v20, %v741_v21 }
 0x514   : > { %752 = vst [vmem:[%s253_s10] sm:$0xff] %v750_v22 }
 0x515   : > { %1091 = shalt.err (!%p1088_p3)
}
 0x516   : > { %s1092_s23 = scalar_lea.hbm %s1413_s26, 256  ;;  %s1096_s27 = scalar_lea.hbm %s1464_s4, 512 }
 0x517   : > { %p1093_p12 = scmp.ne.s32.totalorder %s1413_s26, %s1092_s23  ;;  %p1097_p2 = scmp.lt.u32.totalorder %s1413_s26, %s1464_s4 }
 0x518   : > { %p1098_p10 = scmp.lt.u32.totalorder %s1096_s27, %s1092_s23  ;;  %p1100_p13 = scmp.lt.u32.totalorder %s1092_s23, %s1413_s26 }
 0x519   : > { %p1094_p8 = pnand %p1093_p12, %p1475_p1 }
 0x51a   : > { %p1099_p6 = por %p1098_p10, %p1097_p2 }
 0x51b   : > { %p1095_p0 = pneg %p1094_p8 }
 0x51c   : > { %p1101_p11 = por %p1100_p13, %p1099_p6 }
 0x51e   : > { %p1102_p4 = pnand %p1101_p11, %p1095_p0 }
 0x520   : > { %1105 = shalt.err (!%p1102_p4)
}
 0x521   : > { %s1161_s8 = smov 128   ;;  %s1162_s10 = smov 8  }
 0x522   : > { %949 = dma.vmem_to_hbm [thread:$0]  (%p1475_p1), %s1405_s30, 256, %s1413_s26, %s755_s3, %s1161_s8, %s1161_s8, %s1162_s10  }
 0x523 PF: > { %s783_s14 = sand.u32 1, %s1136_s17   ;;  %p1476_p5 = scmp.ne.s32.totalorder %s1470_s29, 0 }
 0x524   : > { %p1477_p7 = scmp.ge.s32.totalorder %s1148_s20, 2  ;;  %s784_s16 = scalar_lea.sflag [#allocation5], %s783_s14 }
 0x526   : > { %p959_p9 = pnand %p1477_p7, %p1476_p5 }
 0x528   : > { %1131 = dma.done.wait (!%p959_p9), %s784_s16, 256  }
 0x529   : > { %1133 = vsyncadd (!%p959_p9), %s784_s16, 4294967040  ;;  %p21_p3 = scmp.ge.s32.totalorder %s1216_s22, 4   ;;  %s1478_s17 = smov %s1140_s18 }
 0x52a   : > { %s1479_s18 = smov %s1144_s19  ;;  %s1480_s19 = smov %s1228_s25 }
 0x52b   : > { %s1481_s20 = smov %s1216_s22  ;;  %23 = sbr.rel (!%p21_p3) target bundleno = 9 (0x9), region = 94 }
 0x532   :  { %789 = vsyncpa [#allocation4], 1 }
 0x533   :  { %791 = vsyncpa [#allocation4 + $0x1], 1 }
 0x534   :  { %792 = vsyncpa [#allocation7], 1 }
 0x535   :  { %794 = vsyncpa [#allocation7 + $0x1], 1 }
 0x536   :  { %795 = vsyncpa [#allocation5], 1 }
 0x537   :  { %797 = vsyncpa [#allocation5 + $0x1], 1 }

</bundles_post_ra>
